<compile_context>
chip_gen: v7x
topology: tpu7x:2x2x1
jax: 0.10.0
libtpu: 0.0.40
codegen_flags: <defaults>
</compile_context>

<pallas_src>
import jax
import jax.numpy as jnp
from jax.experimental import pallas as pl
from jax.experimental.pallas import tpu as pltpu
from jax.scipy.special import erf as _erf_ref  # reference only (outside kernel)

_INV_SQRT2 = 0.7071067811865476


def _erf_approx(x):
    """Abramowitz & Stegun 7.1.26 rational approximation of erf (f32).

    Max abs error ~1.5e-7 vs. exact erf.  Uses one exp (EUP), one approximate
    reciprocal (EUP) + a single Newton-Raphson step (VPU), and a handful of
    mul/add/select — all in bundle slots that overlap with the MXU matmul.
    """
    a1 = 0.254829592
    a2 = -0.284496736
    a3 = 1.421413741
    a4 = -1.453152027
    a5 = 1.061405429
    p = 0.3275911
    ax = jnp.abs(x)
    d = 1.0 + p * ax
    # Approximate reciprocal (EUP) + one NR refinement: ~f32-accurate 1/d
    # without the extra VALU work of a full-precision divide.
    t = pl.reciprocal(d, approx=True)
    t = t * (2.0 - d * t)
    poly = ((((a5 * t + a4) * t + a3) * t + a2) * t + a1) * t
    y = 1.0 - poly * jnp.exp(-ax * ax)
    return jnp.where(x >= 0.0, y, -y)


def _gelu_exact(x):
    # Exact (erf-form) GELU, matching torch: x * 0.5 * (1 + erf(x / sqrt(2))).
    return x * 0.5 * (1.0 + _erf_approx(x * _INV_SQRT2))


def bert_intermediate_kernel(x_ref, wt_ref, b_ref, o_ref):
    # x_ref : (TM, H)  activation tile (input dtype, e.g. bf16/f32)
    # wt_ref: (H, I)   pre-transposed dense weight — VMEM-resident, Buffered(1)
    # b_ref : (1, I)   dense bias
    # o_ref : (TM, I)  output tile
    #
    # Plain NN matmul in the input dtype with f32 accumulation (native MXU
    # path; no in-kernel weight transpose).
    y = jnp.dot(x_ref[...], wt_ref[...], preferred_element_type=jnp.float32)
    y = y + b_ref[...].astype(jnp.float32)
    # NOTE: on a trailing partial token tile the padded rows also go through
    # exp/GELU (harmless; output writes are clipped) — do not add reductions
    # over the row axis here without masking.
    o_ref[...] = _gelu_exact(y).astype(o_ref.dtype)


def _pick_row_tile(T, block_tokens, min_grid_steps=4):
    """Token-tile size.

    Multiple of 8 (sublane), preferring multiples of 256 (MXU M dim), capped
    at block_tokens, and shrunk (when T allows) so the grid has at least
    `min_grid_steps` steps — both v7x TensorCores then get work via the
    "parallel" token axis.
    """
    if T <= 8:
        return T
    if T <= block_tokens:
        if T % 8 == 0 and (T // 8) >= min_grid_steps:
            return max((T // min_grid_steps) // 8 * 8, 8)
        return T  # block == full array extent is always legal
    tm = max(min(block_tokens, T) // 8 * 8, 8)
    if tm >= 256:
        tm = tm // 256 * 256  # align to the MXU M dimension
    while tm > 8 and pl.cdiv(T, tm) < min_grid_steps:
        tm = max((tm // 2) // 8 * 8, 8)
    return tm


def _physical_vmem_bytes():
    try:
        return int(pltpu.get_tpu_info().vmem_capacity_bytes)
    except Exception:
        return 64 << 20  # v7x-safe lower bound


def _vmem_limit_bytes(TM, H, I, act_itemsize, w_itemsize, weight_buffers):
    act = 2 * TM * H * act_itemsize           # double-buffered activation tiles
    out = 2 * TM * I * act_itemsize           # double-buffered output tiles
    w = weight_buffers * H * I * w_itemsize   # resident (pre-transposed) weight
    b = weight_buffers * 8 * I * 4            # bias, sublane-padded
    interm = TM * I * 4                       # f32 matmul/GELU intermediate
    needed = act + out + w + b + interm
    limit = max(int(needed * 1.25) + (2 << 20), 32 << 20)   # 25% + fixed headroom
    # Leave headroom under physical VMEM (64 MiB/TC on v7x -> ~48 MiB ceiling).
    return min(limit, int(_physical_vmem_bytes() * 3 // 4))


def bert_intermediate(hidden_states, weight, bias, *, block_tokens=512):
    """BertIntermediate forward: GELU(hidden_states @ weight.T + bias).

    hidden_states: (B, S, H)
    weight:        (I, H)   -- PyTorch nn.Linear layout (intermediate, hidden)
    bias:          (I,)

    block_tokens tuning: v5e/v6e (128 MiB VMEM) -> 512-1024;
    v7x (64 MiB VMEM, 2 TCs) -> 256-512.  On v5e prefer bf16 activations and
    weights into the matmul (f32 MXU path is several times slower).
    """
    B, S, H = hidden_states.shape
    I = weight.shape[0]
    T = B * S

    x2d = hidden_states.reshape(T, H)
    # One-time HBM-layout transpose (amortized); the kernel then does a plain
    # NN matmul.  For frozen inference weights, keep them pre-transposed.
    w_t = jnp.transpose(weight)  # (H, I)
    b2d = bias.reshape(1, I)

    TM = _pick_row_tile(T, block_tokens)
    grid = (pl.cdiv(T, TM),)

    act_sz = jnp.dtype(hidden_states.dtype).itemsize
    w_sz = jnp.dtype(weight.dtype).itemsize

    cost = pl.CostEstimate(
        flops=2 * T * H * I,
        transcendentals=2 * T * I,  # exp + reciprocal per output element
        bytes_accessed=T * H * act_sz + H * I * w_sz + I * 4 + T * I * act_sz,
    )

    def build(single_buffer_constants):
        const_kw = (
            {"pipeline_mode": pl.Buffered(1)} if single_buffer_constants else {}
        )
        n_w_buf = 1 if single_buffer_constants else 2
        return pl.pallas_call(
            bert_intermediate_kernel,
            out_shape=jax.ShapeDtypeStruct((T, I), hidden_states.dtype),
            grid=grid,
            in_specs=[
                # Activations: pipelined (double-buffered) over token tiles.
                pl.BlockSpec((TM, H), lambda i: (i, 0)),
                # Pre-transposed weight: constant block, single-buffered,
                # fetched once and VMEM-resident across the whole grid.
                pl.BlockSpec((H, I), lambda i: (0, 0), **const_kw),
                # Bias: constant block, single-buffered.
                pl.BlockSpec((1, I), lambda i: (0, 0), **const_kw),
            ],
            out_specs=pl.BlockSpec((TM, I), lambda i: (i, 0)),
            compiler_params=pltpu.CompilerParams(
                # Token tiles are independent -> shard across TCs on v7x.
                dimension_semantics=("parallel",),
                vmem_limit_bytes=_vmem_limit_bytes(TM, H, I, act_sz, w_sz, n_w_buf),
            ),
            cost_estimate=cost,
        )

    try:
        out2d = build(single_buffer_constants=True)(x2d, w_t, b2d)
    except Exception:
        # pipeline_mode is experimental; fall back to default double buffering
        # rather than failing (costs one extra weight copy in VMEM).
        out2d = build(single_buffer_constants=False)(x2d, w_t, b2d)

    return out2d.reshape(B, S, I)


def reference(hidden_states, weight, bias):
    y = jnp.einsum("bsh,ih->bsi", hidden_states, weight) + bias
    return y * 0.5 * (1.0 + _erf_ref(y * _INV_SQRT2))


if __name__ == "__main__":
    # Small shapes consistent with BertIntermediate: intermediate = 4 * hidden.
    B, S, H, I = 2, 8, 32, 128

    key = jax.random.PRNGKey(0)
    k1, k2, k3 = jax.random.split(key, 3)

    hidden_states = jax.random.normal(k1, (B, S, H), dtype=jnp.float32)

    # Deterministic nn.Linear-style uniform init.
    bound = 1.0 / (H ** 0.5)
    weight = jax.random.uniform(k2, (I, H), minval=-bound, maxval=bound, dtype=jnp.float32)
    bias = jax.random.uniform(k3, (I,), minval=-bound, maxval=bound, dtype=jnp.float32)

    # block_tokens=8 -> grid=(2,) so the test exercises the multi-step pipeline
    # with the single-buffered, VMEM-resident weight.
    out = bert_intermediate(hidden_states, weight, bias, block_tokens=8)
    out = jax.block_until_ready(out)

    ref = reference(hidden_states, weight, bias)
    assert out.shape == (B, S, I)
    # Error budget: A&S erf approximation (~1.5e-7) + NR-refined approximate
    # reciprocal -> well inside 1e-4 for f32 (not bit-exact vs torch.erf).
    assert jnp.allclose(out, ref, atol=1e-4, rtol=1e-4), "mismatch vs reference"

    # TODO(synk): only the 'gelu' activation from config.hidden_act is implemented
    # (relu/swish variants of BertIntermediate are not wired up).
    print("KERNEL_OK")
</pallas_src>

<mosaic_0001>
module attributes {stable_mosaic.version = 11 : i64} {
  func.func @bert_intermediate_kernel(%arg0: i32, %arg1: memref<8x32xf32, #tpu.memory_space<vmem>>, %arg2: memref<32x128xf32, #tpu.memory_space<vmem>>, %arg3: memref<1x128xf32, #tpu.memory_space<vmem>>, %arg4: memref<8x128xf32, #tpu.memory_space<vmem>>) attributes {dimension_semantics = [#tpu.dimension_semantics<parallel>], iteration_bounds = array<i64: 2>, scalar_prefetch = 0 : i64, scratch_operands = 0 : i64, tpu.core_type = #tpu.core_type<tc>, window_params = [{transform_indices = @transform_0, window_bounds = array<i64: 8, 32>}, {pipeline_mode = #tpu.pipeline_mode<synchronous>, transform_indices = @transform_1, window_bounds = array<i64: 32, 128>}, {pipeline_mode = #tpu.pipeline_mode<synchronous>, transform_indices = @transform_2, window_bounds = array<i64: 1, 128>}, {transform_indices = @transform_3, window_bounds = array<i64: 8, 128>}]} {
    %c0 = arith.constant 0 : index
    %c0_0 = arith.constant 0 : index
    %0 = vector.load %arg1[%c0, %c0_0] : memref<8x32xf32, #tpu.memory_space<vmem>>, vector<8x32xf32>
    %c0_1 = arith.constant 0 : index
    %c0_2 = arith.constant 0 : index
    %1 = vector.load %arg2[%c0_1, %c0_2] : memref<32x128xf32, #tpu.memory_space<vmem>>, vector<32x128xf32>
    %cst = arith.constant dense<0.000000e+00> : vector<8x128xf32>
    %2 = tpu.matmul %0, %1, %cst {dimension_numbers = #tpu.dot_dimension_numbers<[1], [0], [0], [1], [0, 0, 1, 1], [], []>} : vector<8x32xf32>, vector<32x128xf32>, vector<8x128xf32> -> vector<8x128xf32>
    %c0_3 = arith.constant 0 : index
    %c0_4 = arith.constant 0 : index
    %3 = vector.load %arg3[%c0_3, %c0_4] : memref<1x128xf32, #tpu.memory_space<vmem>>, vector<1x128xf32>
    %4 = vector.broadcast %3 : vector<1x128xf32> to vector<8x128xf32>
    %5 = arith.addf %2, %4 : vector<8x128xf32>
    %cst_5 = arith.constant 5.000000e-01 : f32
    %6 = vector.broadcast %cst_5 : f32 to vector<8x128xf32>
    %7 = arith.mulf %5, %6 : vector<8x128xf32>
    %cst_6 = arith.constant 0.707106769 : f32
    %8 = vector.broadcast %cst_6 : f32 to vector<8x128xf32>
    %9 = arith.mulf %5, %8 : vector<8x128xf32>
    %10 = math.absf %9 : vector<8x128xf32>
    %cst_7 = arith.constant 0.327591091 : f32
    %11 = vector.broadcast %cst_7 : f32 to vector<8x128xf32>
    %12 = arith.mulf %11, %10 : vector<8x128xf32>
    %cst_8 = arith.constant 1.000000e+00 : f32
    %13 = vector.broadcast %cst_8 : f32 to vector<8x128xf32>
    %14 = arith.addf %13, %12 : vector<8x128xf32>
    %15 = tpu.reciprocal %14 {approx = true} : vector<8x128xf32> -> vector<8x128xf32>
    %16 = arith.mulf %14, %15 : vector<8x128xf32>
    %cst_9 = arith.constant 2.000000e+00 : f32
    %17 = vector.broadcast %cst_9 : f32 to vector<8x128xf32>
    %18 = arith.subf %17, %16 : vector<8x128xf32>
    %19 = arith.mulf %15, %18 : vector<8x128xf32>
    %cst_10 = arith.constant 1.06140542 : f32
    %20 = vector.broadcast %cst_10 : f32 to vector<8x128xf32>
    %21 = arith.mulf %20, %19 : vector<8x128xf32>
    %cst_11 = arith.constant -1.45315206 : f32
    %22 = vector.broadcast %cst_11 : f32 to vector<8x128xf32>
    %23 = arith.addf %21, %22 : vector<8x128xf32>
    %24 = arith.mulf %23, %19 : vector<8x128xf32>
    %cst_12 = arith.constant 1.42141378 : f32
    %25 = vector.broadcast %cst_12 : f32 to vector<8x128xf32>
    %26 = arith.addf %24, %25 : vector<8x128xf32>
    %27 = arith.mulf %26, %19 : vector<8x128xf32>
    %cst_13 = arith.constant -0.284496725 : f32
    %28 = vector.broadcast %cst_13 : f32 to vector<8x128xf32>
    %29 = arith.addf %27, %28 : vector<8x128xf32>
    %30 = arith.mulf %29, %19 : vector<8x128xf32>
    %cst_14 = arith.constant 0.254829586 : f32
    %31 = vector.broadcast %cst_14 : f32 to vector<8x128xf32>
    %32 = arith.addf %30, %31 : vector<8x128xf32>
    %33 = arith.mulf %32, %19 : vector<8x128xf32>
    %cst_15 = arith.constant 0.000000e+00 : f32
    %34 = vector.broadcast %cst_15 : f32 to vector<8x128xf32>
    %35 = arith.subf %34, %10 : vector<8x128xf32>
    %36 = arith.mulf %35, %10 : vector<8x128xf32>
    %37 = math.exp %36 : vector<8x128xf32>
    %38 = arith.mulf %33, %37 : vector<8x128xf32>
    %cst_16 = arith.constant 1.000000e+00 : f32
    %39 = vector.broadcast %cst_16 : f32 to vector<8x128xf32>
    %40 = arith.subf %39, %38 : vector<8x128xf32>
    %cst_17 = arith.constant 0.000000e+00 : f32
    %41 = vector.broadcast %cst_17 : f32 to vector<8x128xf32>
    %42 = arith.cmpf oge, %9, %41 : vector<8x128xf32>
    %cst_18 = arith.constant 0.000000e+00 : f32
    %43 = vector.broadcast %cst_18 : f32 to vector<8x128xf32>
    %44 = arith.subf %43, %40 : vector<8x128xf32>
    %45 = arith.select %42, %40, %44 : vector<8x128xi1>, vector<8x128xf32>
    %cst_19 = arith.constant 1.000000e+00 : f32
    %46 = vector.broadcast %cst_19 : f32 to vector<8x128xf32>
    %47 = arith.addf %46, %45 : vector<8x128xf32>
    %48 = arith.mulf %7, %47 : vector<8x128xf32>
    %c0_20 = arith.constant 0 : index
    %c0_21 = arith.constant 0 : index
    %49 = vector.load %arg4[%c0_20, %c0_21] : memref<8x128xf32, #tpu.memory_space<vmem>>, vector<8x128xf32>
    tpu.vector_store %arg4[%c0_20, %c0_21], %48 {strides = array<i32>} : memref<8x128xf32, #tpu.memory_space<vmem>>, vector<8x128xf32>,
    return
  }
  func.func @transform_0(%arg0: i32) -> (i32, i32) {
    %c0_i32 = arith.constant 0 : i32
    %c0_i32_0 = arith.constant 0 : i32
    return %arg0, %c0_i32 : i32, i32
  }
  func.func @transform_1(%arg0: i32) -> (i32, i32) {
    %c0_i32 = arith.constant 0 : i32
    %c0_i32_0 = arith.constant 0 : i32
    %c0_i32_1 = arith.constant 0 : i32
    return %c0_i32, %c0_i32_0 : i32, i32
  }
  func.func @transform_2(%arg0: i32) -> (i32, i32) {
    %c0_i32 = arith.constant 0 : i32
    %c0_i32_0 = arith.constant 0 : i32
    %c0_i32_1 = arith.constant 0 : i32
    return %c0_i32, %c0_i32_0 : i32, i32
  }
  func.func @transform_3(%arg0: i32) -> (i32, i32) {
    %c0_i32 = arith.constant 0 : i32
    %c0_i32_0 = arith.constant 0 : i32
    return %arg0, %c0_i32 : i32, i32
  }
}

module attributes {stable_mosaic.version = 11 : i64} {
  func.func @bert_intermediate_kernel(%arg0: i32, %arg1: memref<8x32xf32, #tpu.memory_space<vmem>>, %arg2: memref<32x128xf32, #tpu.memory_space<vmem>>, %arg3: memref<1x128xf32, #tpu.memory_space<vmem>>, %arg4: memref<8x128xf32, #tpu.memory_space<vmem>>) attributes {dimension_semantics = [#tpu.dimension_semantics<parallel>], iteration_bounds = array<i64: 2>, scalar_prefetch = 0 : i64, scratch_operands = 0 : i64, tpu.core_type = #tpu.core_type<tc>, window_params = [{transform_indices = @transform_0, window_bounds = array<i64: 8, 32>}, {pipeline_mode = #tpu.pipeline_mode<synchronous>, transform_indices = @transform_1, window_bounds = array<i64: 32, 128>}, {pipeline_mode = #tpu.pipeline_mode<synchronous>, transform_indices = @transform_2, window_bounds = array<i64: 1, 128>}, {transform_indices = @transform_3, window_bounds = array<i64: 8, 128>}]} {
    %c0 = arith.constant 0 : index
    %c0_0 = arith.constant 0 : index
    %0 = vector.load %arg1[%c0, %c0_0] : memref<8x32xf32, #tpu.memory_space<vmem>>, vector<8x32xf32>
    %c0_1 = arith.constant 0 : index
    %c0_2 = arith.constant 0 : index
    %1 = vector.load %arg2[%c0_1, %c0_2] : memref<32x128xf32, #tpu.memory_space<vmem>>, vector<32x128xf32>
    %cst = arith.constant dense<0.000000e+00> : vector<8x128xf32>
    %2 = tpu.matmul %0, %1, %cst {dimension_numbers = #tpu.dot_dimension_numbers<[1], [0], [0], [1], [0, 0, 1, 1], [], []>} : vector<8x32xf32>, vector<32x128xf32>, vector<8x128xf32> -> vector<8x128xf32>
    %c0_3 = arith.constant 0 : index
    %c0_4 = arith.constant 0 : index
    %3 = vector.load %arg3[%c0_3, %c0_4] : memref<1x128xf32, #tpu.memory_space<vmem>>, vector<1x128xf32>
    %4 = vector.broadcast %3 : vector<1x128xf32> to vector<8x128xf32>
    %5 = arith.addf %2, %4 : vector<8x128xf32>
    %cst_5 = arith.constant 5.000000e-01 : f32
    %6 = vector.broadcast %cst_5 : f32 to vector<8x128xf32>
    %7 = arith.mulf %5, %6 : vector<8x128xf32>
    %cst_6 = arith.constant 0.707106769 : f32
    %8 = vector.broadcast %cst_6 : f32 to vector<8x128xf32>
    %9 = arith.mulf %5, %8 : vector<8x128xf32>
    %10 = math.absf %9 : vector<8x128xf32>
    %cst_7 = arith.constant 0.327591091 : f32
    %11 = vector.broadcast %cst_7 : f32 to vector<8x128xf32>
    %12 = arith.mulf %11, %10 : vector<8x128xf32>
    %cst_8 = arith.constant 1.000000e+00 : f32
    %13 = vector.broadcast %cst_8 : f32 to vector<8x128xf32>
    %14 = arith.addf %13, %12 : vector<8x128xf32>
    %15 = tpu.reciprocal %14 {approx = true} : vector<8x128xf32> -> vector<8x128xf32>
    %16 = arith.mulf %14, %15 : vector<8x128xf32>
    %cst_9 = arith.constant 2.000000e+00 : f32
    %17 = vector.broadcast %cst_9 : f32 to vector<8x128xf32>
    %18 = arith.subf %17, %16 : vector<8x128xf32>
    %19 = arith.mulf %15, %18 : vector<8x128xf32>
    %cst_10 = arith.constant 1.06140542 : f32
    %20 = vector.broadcast %cst_10 : f32 to vector<8x128xf32>
    %21 = arith.mulf %20, %19 : vector<8x128xf32>
    %cst_11 = arith.constant -1.45315206 : f32
    %22 = vector.broadcast %cst_11 : f32 to vector<8x128xf32>
    %23 = arith.addf %21, %22 : vector<8x128xf32>
    %24 = arith.mulf %23, %19 : vector<8x128xf32>
    %cst_12 = arith.constant 1.42141378 : f32
    %25 = vector.broadcast %cst_12 : f32 to vector<8x128xf32>
    %26 = arith.addf %24, %25 : vector<8x128xf32>
    %27 = arith.mulf %26, %19 : vector<8x128xf32>
    %cst_13 = arith.constant -0.284496725 : f32
    %28 = vector.broadcast %cst_13 : f32 to vector<8x128xf32>
    %29 = arith.addf %27, %28 : vector<8x128xf32>
    %30 = arith.mulf %29, %19 : vector<8x128xf32>
    %cst_14 = arith.constant 0.254829586 : f32
    %31 = vector.broadcast %cst_14 : f32 to vector<8x128xf32>
    %32 = arith.addf %30, %31 : vector<8x128xf32>
    %33 = arith.mulf %32, %19 : vector<8x128xf32>
    %cst_15 = arith.constant 0.000000e+00 : f32
    %34 = vector.broadcast %cst_15 : f32 to vector<8x128xf32>
    %35 = arith.subf %34, %10 : vector<8x128xf32>
    %36 = arith.mulf %35, %10 : vector<8x128xf32>
    %37 = math.exp %36 : vector<8x128xf32>
    %38 = arith.mulf %33, %37 : vector<8x128xf32>
    %cst_16 = arith.constant 1.000000e+00 : f32
    %39 = vector.broadcast %cst_16 : f32 to vector<8x128xf32>
    %40 = arith.subf %39, %38 : vector<8x128xf32>
    %cst_17 = arith.constant 0.000000e+00 : f32
    %41 = vector.broadcast %cst_17 : f32 to vector<8x128xf32>
    %42 = arith.cmpf oge, %9, %41 : vector<8x128xf32>
    %cst_18 = arith.constant 0.000000e+00 : f32
    %43 = vector.broadcast %cst_18 : f32 to vector<8x128xf32>
    %44 = arith.subf %43, %40 : vector<8x128xf32>
    %45 = arith.select %42, %40, %44 : vector<8x128xi1>, vector<8x128xf32>
    %cst_19 = arith.constant 1.000000e+00 : f32
    %46 = vector.broadcast %cst_19 : f32 to vector<8x128xf32>
    %47 = arith.addf %46, %45 : vector<8x128xf32>
    %48 = arith.mulf %7, %47 : vector<8x128xf32>
    %c0_20 = arith.constant 0 : index
    %c0_21 = arith.constant 0 : index
    %49 = vector.load %arg4[%c0_20, %c0_21] : memref<8x128xf32, #tpu.memory_space<vmem>>, vector<8x128xf32>
    tpu.vector_store %arg4[%c0_20, %c0_21], %48 {strides = array<i32>} : memref<8x128xf32, #tpu.memory_space<vmem>>, vector<8x128xf32>,
    return
  }
  func.func @transform_0(%arg0: i32) -> (i32, i32) {
    %c0_i32 = arith.constant 0 : i32
    %c0_i32_0 = arith.constant 0 : i32
    return %arg0, %c0_i32 : i32, i32
  }
  func.func @transform_1(%arg0: i32) -> (i32, i32) {
    %c0_i32 = arith.constant 0 : i32
    %c0_i32_0 = arith.constant 0 : i32
    %c0_i32_1 = arith.constant 0 : i32
    return %c0_i32, %c0_i32_0 : i32, i32
  }
  func.func @transform_2(%arg0: i32) -> (i32, i32) {
    %c0_i32 = arith.constant 0 : i32
    %c0_i32_0 = arith.constant 0 : i32
    %c0_i32_1 = arith.constant 0 : i32
    return %c0_i32, %c0_i32_0 : i32, i32
  }
  func.func @transform_3(%arg0: i32) -> (i32, i32) {
    %c0_i32 = arith.constant 0 : i32
    %c0_i32_0 = arith.constant 0 : i32
    return %arg0, %c0_i32 : i32, i32
  }
}

</mosaic_0001>

<bundles_post_ra>
// kernel: tpu_custom_call.1
= control target key start
LH: loop header
LB: loop body
LE: loop exit
PB: predicated region body
PF: predicated region fallthrough
CT: control target
= control target key end

     0   :  { %8 = vsyncpa [#allocation3], 0  ;;  %s876_s0 = inlined_call_operand.hbm [shape: f32[16,32], index: 0, kind: input, shape index: {}]   ;;  %s877_s1 = inlined_call_operand.hbm [shape: f32[32,128], index: 1, kind: input, shape index: {}]   ;;  %s878_s2 = inlined_call_operand.vmem [shape: f32[1,128], index: 2, kind: input, shape index: {}]   ;;  %s879_s3 = inlined_call_operand.hbm [shape: f32[16,128], index: 3, kind: output, shape index: {}]  }
   0x1   :  { %10 = vsyncpa [#allocation3 + $0x1], 0 }
   0x2   :  { %11 = vsyncpa [#allocation6], 0 }
   0x3   :  { %12 = vsyncpa [#allocation4], 0 }
   0x4   :  { %14 = vsyncpa [#allocation4 + $0x1], 0  ;;  %s673_s12 = smov 0   ;;  %s675_s13 = smov 0  }
   0x5   :  { %s677_s14 = smov 0   ;;  %s679_s15 = smov 0  }
   0x6 LB: > { %s694_s16 = sadd.s32 4294967295, %s643_s15   ;;  %s411_s17 = sadd.s32 4294967294, %s643_s15   ;;  %s643_s15 = sphi %s679_s15, %s899_s15   ;;  %s639_s14 = sphi %s677_s14, %s898_s14   ;;  %s635_s13 = sphi %s675_s13, %s897_s13   ;;  %s631_s12 = sphi %s673_s12, %s896_s12  }
   0x7   : > { %p40_p0 = scmp.ne.s32.totalorder %s635_s13, %s631_s12  ;;  %p880_p1 = scmp.eq.s32.totalorder %s694_s16, 0 }
   0x8   : > { %p112_p3 = scmp.eq.s32.totalorder %s411_s17, 1  ;;  %p412_p5 = scmp.ge.s32.totalorder %s643_s15, 1 }
   0x9   : > { %p703_p4 = por %p880_p1, %p40_p0  ;;  %p119_p7 = scmp.lt.s32.totalorder %s643_s15, 3 }
   0xa   : > { %p708_p6 = por %p112_p3, %p40_p0  ;;  %s645_s21 = smov [#allocation5]  }
   0xb   : > { %s883_s18 = scalar_select %p703_p4, 1, 0 }
   0xc   : > { %s884_s19 = scalar_select %p708_p6, 1, 0 }
   0xd   : > { %p713_p8 = pnand %p412_p5, %p119_p7  ;;  %s131_s22 = sshll.u32 %s645_s21, 4  ;;  %s717_s22 = int_to_ptr.vmem [resolvable:$true] %s131_s22 }
   0xe   : > { %s729_s24 = sadd.s32 1, %s643_s15   ;;  %s27_s25 = sadd.s32 1, %s639_s14 }
   0xf   : > { %s885_s20 = scalar_select %p713_p8, 1, 0 }
  0x10   : > { %p457_p9 = pneg %p713_p8  ;;  %s24_s26 = ssub.s32 %s643_s15, %s729_s24 }
  0x11   : > { %s515_s29 = scalar_lea.hbm %s877_s1, 512 }
  0x12   : > { %p724_p11 = pnand %p457_p9, %p880_p1  ;;  %p516_p12 = scmp.ne.s32.totalorder %s877_s1, %s515_s29 }
  0x13   : > { %p522_p5 = scmp.lt.u32.totalorder %s515_s29, %s877_s1 }
  0x14   : > { %p517_p13 = pneg %p724_p11 }
  0x16   : > { %p518_p0 = pnand %p517_p13, %p516_p12 }
  0x18   : > { %p519_p3 = pneg %p518_p0 }
  0x1a   : > { %p524_p7 = pnand %p522_p5, %p519_p3 }
  0x1c   : > { %527 = shalt.err (!%p524_p7)
}
  0x1d   : > { %s528_s7 = scalar_lea.vmem %s717_s22, 512  ;;  %p536_p2 = scmp.lt.s32.totalorder %s717_s22, %s717_s22 }
  0x1e   : > { %p529_p9 = scmp.ne.s32.totalorder %s717_s22, %s528_s7  ;;  %p537_p6 = scmp.lt.s32.totalorder %s528_s7, %s528_s7 }
  0x20   : > { %p531_p10 = pnand %p529_p9, %p517_p13  ;;  %p538_p4 = por %p537_p6, %p536_p2 }
  0x22   : > { %p532_p1 = pneg %p531_p10 }
  0x24   : > { %p539_p8 = pnand %p538_p4, %p532_p1 }
  0x26   : > { %542 = shalt.err (!%p539_p8)
}
  0x27   : > { %s646_s8 = smov 128   ;;  %s647_s9 = smov 8  }
  0x28   : > { %460 = dma.hbm_to_vmem [thread:$0]  (!%p724_p11), %s877_s1, 512, %s717_s22, [#allocation6], %s646_s8, %s646_s8, %s647_s9  }
  0x29   : > { %p25_p2 = scmp.eq.s32.totalorder %s24_s26, 0  ;;  %p34_p1 = scmp.ne.s32.totalorder %s639_s14, %s635_s13 }
  0x2a   : > { %p35_p4 = scmp.eq.s32.totalorder %s643_s15, 0  ;;  %p470_p6 = scmp.lt.s32.totalorder %s643_s15, 2 }
  0x2b   : > { %s760_s17 = scalar_select %p25_p2, %s639_s14, %s27_s25  }
  0x2c   : > { %p36_p8 = por %p35_p4, %p34_p1  ;;  %p887_p10 = scmp.eq.s32.totalorder %s694_s16, 1 }
  0x2d   : > { %s148_s27 = sand.u32 1, %s639_s14   ;;  %s416_s28 = sshll.u32 %s643_s15, 7 }
  0x2e   : > { %p764_p12 = por %p887_p10, %p34_p1  ;;  %s415_s29 = sshll.u32 %s148_s27, 3 }
  0x2f   : > { %s773_s4 = scalar_lea.hbm %s876_s0, %s416_s28  ;;  %s152_s22 = scalar_lea.vmem [#allocation2], %s415_s29 }
  0x30   : > { %s159_s25 = sshll.u32 %s152_s22, 4  ;;  %p775_p11 = pnand %p470_p6, %p36_p8  ;;  %s779_s25 = int_to_ptr.vmem [resolvable:$true] %s159_s25 }
  0x31   : > { %s149_s5 = scalar_lea.sflag [#allocation3], %s148_s27  ;;  %s543_s6 = scalar_lea.hbm %s773_s4, 128 }
  0x32   : > { %p544_p13 = scmp.ne.s32.totalorder %s773_s4, %s543_s6  ;;  %p545_p0 = pneg %p775_p11 }
  0x33   : > { %s548_s9 = scalar_lea.hbm %s876_s0, 256  ;;  %p549_p7 = scmp.lt.u32.totalorder %s773_s4, %s876_s0 }
  0x34   : > { %p546_p3 = pnand %p545_p0, %p544_p13  ;;  %p550_p9 = scmp.lt.u32.totalorder %s548_s9, %s543_s6 }
  0x35   : > { %p552_p1 = scmp.lt.u32.totalorder %s543_s6, %s773_s4 }
  0x36   : > { %p547_p5 = pneg %p546_p3  ;;  %p551_p2 = por %p550_p9, %p549_p7 }
  0x38   : > { %p553_p4 = por %p552_p1, %p551_p2 }
  0x3a   : > { %p554_p6 = pnand %p553_p4, %p547_p5 }
  0x3c   : > { %557 = shalt.err (!%p554_p6)
}
  0x3d   : > { %s558_s27 = scalar_lea.vmem %s779_s25, 128  ;;  %s648_s28 = smov [#allocation2]  }
  0x3e   : > { %p559_p8 = scmp.ne.s32.totalorder %s779_s25, %s558_s27  ;;  %s563_s29 = sshll.u32 %s648_s28, 4  ;;  %s564_s29 = int_to_ptr.vmem [resolvable:$false] %s563_s29 }
  0x3f   : > { %s565_s23 = scalar_lea.vmem %s564_s29, 256  ;;  %p566_p3 = scmp.lt.s32.totalorder %s779_s25, %s564_s29 }
  0x40   : > { %p561_p10 = pnand %p559_p8, %p545_p0  ;;  %p567_p7 = scmp.lt.s32.totalorder %s565_s23, %s558_s27 }
  0x42   : > { %p562_p13 = pneg %p561_p10  ;;  %p568_p9 = por %p567_p7, %p566_p3 }
  0x44   : > { %p569_p2 = pnand %p568_p9, %p562_p13 }
  0x46   : > { %572 = shalt.err (!%p569_p2)
}
  0x47   : > { %464 = dma.hbm_to_vmem [thread:$0]  (!%p775_p11), %s773_s4, 128, %s779_s25, %s149_s5  }
  0x48   : > { %p890_p5 = scmp.ne.s32.totalorder %s885_s20, 0 }
  0x49   : > { %s809_s30 = sand.u32 (!%p890_p5), 1, %s635_s13   ;;  %p891_p0 = scmp.ne.s32.totalorder (!%p890_p5), %s883_s18, 0 }
  0x4a   : > { %168 = sbr.rel (%p890_p5) target bundleno = 377 (0x179), region = 32  ;;  %s418_s22 = sshll.u32 (!%p890_p5), %s809_s30, 3 }
  0x4b   : > { %s171_s6 = scalar_lea.sflag (!%p890_p5), [#allocation3], %s809_s30  ;;  %s174_s7 = scalar_lea.vmem (!%p890_p5), [#allocation2], %s418_s22 }
  0x51   : > { %618 = dma.done.wait (%p891_p0), %s171_s6, 128  }
  0x52   : > { %620 = vsyncadd (%p891_p0), %s171_s6, 4294967168  ;;  %p892_p11 = scmp.eq.s32.totalorder %s694_s16, 0 }
  0x54   : > { %622 = dma.done.wait (%p892_p11), [#allocation6], 512   ;;  %p893_p1 = pmov %p892_p11 }
  0x55   : > { %v649_v0 = vmov 0.0|0.0   ;;  %vm650_vm0 = vmmov 0   ;;  %v651_v1 = vmov 0.0   ;;  %v202_v2 = vld [vmem:[#allocation5] sm:$0xff]  ;;  %v203_v3 = vld [vmem:[#allocation5 + $0x8] sm:$0xff]  ;;  %v204_v4 = vld [vmem:[#allocation5 + $0x10] sm:$0xff] }
  0x56   : > { %624 = vsyncadd (%p893_p1), [#allocation6], 4294966784  ;;  %443 = vmatprep.subr.bf16.mxu0 %v649_v0  ;;  %440 = vmatprep.mubr.msk.f32.mxu0 %vm650_vm0, %v651_v1  ;;  %v444_v5 = vpack.c.bf16 %v203_v3, %v202_v2  ;;  %v205_v6 = vld [vmem:[#allocation5 + $0x18] sm:$0xff]  ;;  %vm213_vm1 = vcmask 261120   ;;  %v421_v9 = vld [vmem:[%s878_s2] ss:$0 sm:$0xff] }
  0x57   : > { %v447_v7 = vpack.c.bf16 %v205_v6, %v204_v4  ;;  %v201_v8 = vld [vmem:[%s174_s7] sm:$0xff]  ;;  %s424_s4 = sshll.u32 %s694_s16, 7  ;;  %s200_s25 = scalar_lea.vmem [#allocation7], %s418_s22 }
  0x58   : > { %445 = vmatpush3.bf16.msra.mxu0 %v444_v5  ;;  %s331_s26 = sshll.u32 %s200_s25, 4  ;;  %s832_s9 = scalar_lea.hbm %s879_s3, %s424_s4  ;;  %s834_s26 = int_to_ptr.vmem [resolvable:$true] %s331_s26 }
  0x59   : > { %446 = vmatprep.subr.bf16.mxu0 %v649_v0  ;;  %s318_s10 = scalar_lea.sflag [#allocation4], %s809_s30  ;;  %s573_s11 = scalar_lea.vmem %s834_s26, 128 }
  0x5a   : > { %p574_p4 = scmp.ne.s32.totalorder %s834_s26, %s573_s11  ;;  %s652_s16 = smov [#allocation7]  }
  0x5b   : > { %s577_s27 = sshll.u32 %s652_s16, 4  ;;  %s578_s27 = int_to_ptr.vmem [resolvable:$false] %s577_s27 }
  0x5c   : > { %448 = vmatpush3.bf16.msra.mxu0 %v447_v7  ;;  %p575_p6 = pnand %p574_p4, %p764_p12  ;;  %s579_s28 = scalar_lea.vmem %s578_s27, 256 }
  0x5d   : > { %p580_p10 = scmp.lt.s32.totalorder %s834_s26, %s578_s27  ;;  %p581_p13 = scmp.lt.s32.totalorder %s579_s28, %s573_s11 }
  0x5e   : > { %p576_p8 = pneg %p575_p6 }
  0x5f   : > { %441 = vmatmul.mubr.msk.f32.vlgmr.msra.gmra.mrb[0].mxu0 %vm213_vm1, %v201_v8  ;;  %p582_p3 = por %p581_p13, %p580_p10 }
  0x61   : > { %p583_p7 = pnand %p582_p3, %p576_p8 }
 0x132   : > { %v283_v10 = vpop.f32.mrb[0].mxu0 }
 0x133   : > { %v284_v11 = vadd.f32 %v421_v9, %v283_v10  ;;  %v442_v12 = vpop.f32.mrb[1].mxu0 }
 0x135   : > { %v288_v13 = vmul.f32 0.70710677, %v284_v11  ;;  %v287_v38 = vmul.f32 0.5, %v284_v11 }
 0x137   : > { %v289_v14 = vand.u32 2147483647, %v288_v13  ;;  %vm311_vm2 = vcmp.ge.f32.partialorder %v288_v13, 0.0 }
 0x139   : > { %v290_v15 = vmul.f32 0.3275911, %v289_v14  ;;  %v305_v19 = vsub.f32 0.0, %v289_v14 }
 0x13b   : > { %v291_v16 = vadd.f32 1.0, %v290_v15  ;;  %v306_v22 = vmul.f32 %v305_v19, %v289_v14 }
 0x13d   : > { %511 = vrcp.f32 %v291_v16  ;;  %v307_v25 = vmul.f32 1.442695, %v306_v22 }
 0x13f   : > { %513 = vpow2.f32 %v307_v25 }
 0x147   : > { %v512_v17 = vpop.eup %511 }
 0x148   : > { %v293_v18 = vmul.f32 %v512_v17, %v291_v16 }
 0x149   : > { %v514_v33 = vpop.eup %513 }
 0x14a   : > { %v294_v20 = vsub.f32 2.0, %v293_v18 }
 0x14c   : > { %v295_v21 = vmul.f32 %v512_v17, %v294_v20 }
 0x14e   : > { %v296_v23 = vmul.f32 1.0614054, %v295_v21 }
 0x150   : > { %v297_v24 = vadd.f32 -1.4531521, %v296_v23 }
 0x152   : > { %v298_v26 = vmul.f32 %v297_v24, %v295_v21 }
 0x154   : > { %v299_v27 = vadd.f32 1.4214138, %v298_v26 }
 0x156   : > { %v300_v28 = vmul.f32 %v299_v27, %v295_v21 }
 0x158   : > { %v301_v29 = vadd.f32 -0.28449672, %v300_v28 }
 0x15a   : > { %v302_v30 = vmul.f32 %v301_v29, %v295_v21 }
 0x15c   : > { %v303_v31 = vadd.f32 0.2548296, %v302_v30 }
 0x15e   : > { %v304_v32 = vmul.f32 %v303_v31, %v295_v21 }
 0x160   : > { %v309_v34 = vmul.f32 %v514_v33, %v304_v32 }
 0x162   : > { %v310_v35 = vsub.f32 1.0, %v309_v34 }
 0x164   : > { %v312_v36 = vsub.f32 0.0, %v310_v35 }
 0x166   : > { %v313_v37 = vsel %vm311_vm2, %v310_v35, %v312_v36 }
 0x167   : > { %v314_v39 = vadd.f32 1.0, %v313_v37 }
 0x169   : > { %v315_v40 = vmul.f32 %v314_v39, %v287_v38 }
 0x16b   : > { %316 = vst [vmem:[%s200_s25] sm:$0xff] %v315_v40 }
 0x16c   : > { %586 = shalt.err (!%p583_p7)
}
 0x16d   : > { %s587_s29 = scalar_lea.hbm %s832_s9, 128  ;;  %s591_s22 = scalar_lea.hbm %s879_s3, 256 }
 0x16e   : > { %p588_p9 = scmp.ne.s32.totalorder %s832_s9, %s587_s29  ;;  %p592_p0 = scmp.lt.u32.totalorder %s832_s9, %s879_s3 }
 0x16f   : > { %p593_p11 = scmp.lt.u32.totalorder %s591_s22, %s587_s29  ;;  %p595_p4 = scmp.lt.u32.totalorder %s587_s29, %s832_s9 }
 0x170   : > { %p589_p2 = pnand %p588_p9, %p764_p12 }
 0x171   : > { %p594_p1 = por %p593_p11, %p592_p0 }
 0x172   : > { %p590_p5 = pneg %p589_p2 }
 0x173   : > { %p596_p6 = por %p595_p4, %p594_p1 }
 0x175   : > { %p597_p8 = pnand %p596_p6, %p590_p5 }
 0x177   : > { %600 = shalt.err (!%p597_p8)
}
 0x178   : > { %455 = dma.vmem_to_hbm [thread:$0]  (%p764_p12), %s834_s26, 128, %s832_s9, %s318_s10  }
 0x179 PF: > { %s343_s18 = sand.u32 1, %s631_s12   ;;  %p894_p10 = scmp.ne.s32.totalorder %s884_s19, 0 }
 0x17a   : > { %p895_p13 = scmp.ge.s32.totalorder %s643_s15, 2  ;;  %s344_s20 = scalar_lea.sflag [#allocation4], %s343_s18 }
 0x17c   : > { %p466_p3 = pnand %p895_p13, %p894_p10 }
 0x17e   : > { %626 = dma.done.wait (!%p466_p3), %s344_s20, 128  }
 0x17f   : > { %628 = vsyncadd (!%p466_p3), %s344_s20, 4294967168  ;;  %p17_p7 = scmp.ge.s32.totalorder %s729_s24, 4   ;;  %s896_s12 = smov %s635_s13 }
 0x180   : > { %s897_s13 = smov %s639_s14  ;;  %s898_s14 = smov %s760_s17 }
 0x181   : > { %s899_s15 = smov %s729_s24  ;;  %19 = sbr.rel (!%p17_p7) target bundleno = 6 (0x6), region = 81 }
 0x188   :  { %349 = vsyncpa [#allocation3], 1 }
 0x189   :  { %351 = vsyncpa [#allocation3 + $0x1], 1 }
 0x18a   :  { %352 = vsyncpa [#allocation6], 1 }
 0x18b   :  { %353 = vsyncpa [#allocation4], 1 }
 0x18c   :  { %355 = vsyncpa [#allocation4 + $0x1], 1 }

// kernel: tpu_custom_call.1
= control target key start
LH: loop header
LB: loop body
LE: loop exit
PB: predicated region body
PF: predicated region fallthrough
CT: control target
= control target key end

     0   :  { %8 = vsyncpa [#allocation3], 0  ;;  %s876_s0 = inlined_call_operand.hbm [shape: f32[16,32], index: 0, kind: input, shape index: {}]   ;;  %s877_s1 = inlined_call_operand.hbm [shape: f32[32,128], index: 1, kind: input, shape index: {}]   ;;  %s878_s2 = inlined_call_operand.vmem [shape: f32[1,128], index: 2, kind: input, shape index: {}]   ;;  %s879_s3 = inlined_call_operand.hbm [shape: f32[16,128], index: 3, kind: output, shape index: {}]  }
   0x1   :  { %10 = vsyncpa [#allocation3 + $0x1], 0 }
   0x2   :  { %11 = vsyncpa [#allocation6], 0 }
   0x3   :  { %12 = vsyncpa [#allocation4], 0 }
   0x4   :  { %14 = vsyncpa [#allocation4 + $0x1], 0  ;;  %s673_s12 = smov 0   ;;  %s675_s13 = smov 0  }
   0x5   :  { %s677_s14 = smov 0   ;;  %s679_s15 = smov 0  }
   0x6 LB: > { %s694_s16 = sadd.s32 4294967295, %s643_s15   ;;  %s411_s17 = sadd.s32 4294967294, %s643_s15   ;;  %s643_s15 = sphi %s679_s15, %s899_s15   ;;  %s639_s14 = sphi %s677_s14, %s898_s14   ;;  %s635_s13 = sphi %s675_s13, %s897_s13   ;;  %s631_s12 = sphi %s673_s12, %s896_s12  }
   0x7   : > { %p40_p0 = scmp.ne.s32.totalorder %s635_s13, %s631_s12  ;;  %p880_p1 = scmp.eq.s32.totalorder %s694_s16, 0 }
   0x8   : > { %p112_p3 = scmp.eq.s32.totalorder %s411_s17, 1  ;;  %p412_p5 = scmp.ge.s32.totalorder %s643_s15, 1 }
   0x9   : > { %p703_p4 = por %p880_p1, %p40_p0  ;;  %p119_p7 = scmp.lt.s32.totalorder %s643_s15, 3 }
   0xa   : > { %p708_p6 = por %p112_p3, %p40_p0  ;;  %s645_s21 = smov [#allocation5]  }
   0xb   : > { %s883_s18 = scalar_select %p703_p4, 1, 0 }
   0xc   : > { %s884_s19 = scalar_select %p708_p6, 1, 0 }
   0xd   : > { %p713_p8 = pnand %p412_p5, %p119_p7  ;;  %s131_s22 = sshll.u32 %s645_s21, 4  ;;  %s717_s22 = int_to_ptr.vmem [resolvable:$true] %s131_s22 }
   0xe   : > { %s729_s24 = sadd.s32 1, %s643_s15   ;;  %s27_s25 = sadd.s32 1, %s639_s14 }
   0xf   : > { %s885_s20 = scalar_select %p713_p8, 1, 0 }
  0x10   : > { %p457_p9 = pneg %p713_p8  ;;  %s24_s26 = ssub.s32 %s643_s15, %s729_s24 }
  0x11   : > { %s515_s29 = scalar_lea.hbm %s877_s1, 512 }
  0x12   : > { %p724_p11 = pnand %p457_p9, %p880_p1  ;;  %p516_p12 = scmp.ne.s32.totalorder %s877_s1, %s515_s29 }
  0x13   : > { %p522_p5 = scmp.lt.u32.totalorder %s515_s29, %s877_s1 }
  0x14   : > { %p517_p13 = pneg %p724_p11 }
  0x16   : > { %p518_p0 = pnand %p517_p13, %p516_p12 }
  0x18   : > { %p519_p3 = pneg %p518_p0 }
  0x1a   : > { %p524_p7 = pnand %p522_p5, %p519_p3 }
  0x1c   : > { %527 = shalt.err (!%p524_p7)
}
  0x1d   : > { %s528_s7 = scalar_lea.vmem %s717_s22, 512  ;;  %p536_p2 = scmp.lt.s32.totalorder %s717_s22, %s717_s22 }
  0x1e   : > { %p529_p9 = scmp.ne.s32.totalorder %s717_s22, %s528_s7  ;;  %p537_p6 = scmp.lt.s32.totalorder %s528_s7, %s528_s7 }
  0x20   : > { %p531_p10 = pnand %p529_p9, %p517_p13  ;;  %p538_p4 = por %p537_p6, %p536_p2 }
  0x22   : > { %p532_p1 = pneg %p531_p10 }
  0x24   : > { %p539_p8 = pnand %p538_p4, %p532_p1 }
  0x26   : > { %542 = shalt.err (!%p539_p8)
}
  0x27   : > { %s646_s8 = smov 128   ;;  %s647_s9 = smov 8  }
  0x28   : > { %460 = dma.hbm_to_vmem [thread:$0]  (!%p724_p11), %s877_s1, 512, %s717_s22, [#allocation6], %s646_s8, %s646_s8, %s647_s9  }
  0x29   : > { %p25_p2 = scmp.eq.s32.totalorder %s24_s26, 0  ;;  %p34_p1 = scmp.ne.s32.totalorder %s639_s14, %s635_s13 }
  0x2a   : > { %p35_p4 = scmp.eq.s32.totalorder %s643_s15, 0  ;;  %p470_p6 = scmp.lt.s32.totalorder %s643_s15, 2 }
  0x2b   : > { %s760_s17 = scalar_select %p25_p2, %s639_s14, %s27_s25  }
  0x2c   : > { %p36_p8 = por %p35_p4, %p34_p1  ;;  %p887_p10 = scmp.eq.s32.totalorder %s694_s16, 1 }
  0x2d   : > { %s148_s27 = sand.u32 1, %s639_s14   ;;  %s416_s28 = sshll.u32 %s643_s15, 7 }
  0x2e   : > { %p764_p12 = por %p887_p10, %p34_p1  ;;  %s415_s29 = sshll.u32 %s148_s27, 3 }
  0x2f   : > { %s773_s4 = scalar_lea.hbm %s876_s0, %s416_s28  ;;  %s152_s22 = scalar_lea.vmem [#allocation2], %s415_s29 }
  0x30   : > { %s159_s25 = sshll.u32 %s152_s22, 4  ;;  %p775_p11 = pnand %p470_p6, %p36_p8  ;;  %s779_s25 = int_to_ptr.vmem [resolvable:$true] %s159_s25 }
  0x31   : > { %s149_s5 = scalar_lea.sflag [#allocation3], %s148_s27  ;;  %s543_s6 = scalar_lea.hbm %s773_s4, 128 }
  0x32   : > { %p544_p13 = scmp.ne.s32.totalorder %s773_s4, %s543_s6  ;;  %p545_p0 = pneg %p775_p11 }
  0x33   : > { %s548_s9 = scalar_lea.hbm %s876_s0, 256  ;;  %p549_p7 = scmp.lt.u32.totalorder %s773_s4, %s876_s0 }
  0x34   : > { %p546_p3 = pnand %p545_p0, %p544_p13  ;;  %p550_p9 = scmp.lt.u32.totalorder %s548_s9, %s543_s6 }
  0x35   : > { %p552_p1 = scmp.lt.u32.totalorder %s543_s6, %s773_s4 }
  0x36   : > { %p547_p5 = pneg %p546_p3  ;;  %p551_p2 = por %p550_p9, %p549_p7 }
  0x38   : > { %p553_p4 = por %p552_p1, %p551_p2 }
  0x3a   : > { %p554_p6 = pnand %p553_p4, %p547_p5 }
  0x3c   : > { %557 = shalt.err (!%p554_p6)
}
  0x3d   : > { %s558_s27 = scalar_lea.vmem %s779_s25, 128  ;;  %s648_s28 = smov [#allocation2]  }
  0x3e   : > { %p559_p8 = scmp.ne.s32.totalorder %s779_s25, %s558_s27  ;;  %s563_s29 = sshll.u32 %s648_s28, 4  ;;  %s564_s29 = int_to_ptr.vmem [resolvable:$false] %s563_s29 }
  0x3f   : > { %s565_s23 = scalar_lea.vmem %s564_s29, 256  ;;  %p566_p3 = scmp.lt.s32.totalorder %s779_s25, %s564_s29 }
  0x40   : > { %p561_p10 = pnand %p559_p8, %p545_p0  ;;  %p567_p7 = scmp.lt.s32.totalorder %s565_s23, %s558_s27 }
  0x42   : > { %p562_p13 = pneg %p561_p10  ;;  %p568_p9 = por %p567_p7, %p566_p3 }
  0x44   : > { %p569_p2 = pnand %p568_p9, %p562_p13 }
  0x46   : > { %572 = shalt.err (!%p569_p2)
}
  0x47   : > { %464 = dma.hbm_to_vmem [thread:$0]  (!%p775_p11), %s773_s4, 128, %s779_s25, %s149_s5  }
  0x48   : > { %p890_p5 = scmp.ne.s32.totalorder %s885_s20, 0 }
  0x49   : > { %s809_s30 = sand.u32 (!%p890_p5), 1, %s635_s13   ;;  %p891_p0 = scmp.ne.s32.totalorder (!%p890_p5), %s883_s18, 0 }
  0x4a   : > { %168 = sbr.rel (%p890_p5) target bundleno = 377 (0x179), region = 32  ;;  %s418_s22 = sshll.u32 (!%p890_p5), %s809_s30, 3 }
  0x4b   : > { %s171_s6 = scalar_lea.sflag (!%p890_p5), [#allocation3], %s809_s30  ;;  %s174_s7 = scalar_lea.vmem (!%p890_p5), [#allocation2], %s418_s22 }
  0x51   : > { %618 = dma.done.wait (%p891_p0), %s171_s6, 128  }
  0x52   : > { %620 = vsyncadd (%p891_p0), %s171_s6, 4294967168  ;;  %p892_p11 = scmp.eq.s32.totalorder %s694_s16, 0 }
  0x54   : > { %622 = dma.done.wait (%p892_p11), [#allocation6], 512   ;;  %p893_p1 = pmov %p892_p11 }
  0x55   : > { %v649_v0 = vmov 0.0|0.0   ;;  %vm650_vm0 = vmmov 0   ;;  %v651_v1 = vmov 0.0   ;;  %v202_v2 = vld [vmem:[#allocation5] sm:$0xff]  ;;  %v203_v3 = vld [vmem:[#allocation5 + $0x8] sm:$0xff]  ;;  %v204_v4 = vld [vmem:[#allocation5 + $0x10] sm:$0xff] }
  0x56   : > { %624 = vsyncadd (%p893_p1), [#allocation6], 4294966784  ;;  %443 = vmatprep.subr.bf16.mxu0 %v649_v0  ;;  %440 = vmatprep.mubr.msk.f32.mxu0 %vm650_vm0, %v651_v1  ;;  %v444_v5 = vpack.c.bf16 %v203_v3, %v202_v2  ;;  %v205_v6 = vld [vmem:[#allocation5 + $0x18] sm:$0xff]  ;;  %vm213_vm1 = vcmask 261120   ;;  %v421_v9 = vld [vmem:[%s878_s2] ss:$0 sm:$0xff] }
  0x57   : > { %v447_v7 = vpack.c.bf16 %v205_v6, %v204_v4  ;;  %v201_v8 = vld [vmem:[%s174_s7] sm:$0xff]  ;;  %s424_s4 = sshll.u32 %s694_s16, 7  ;;  %s200_s25 = scalar_lea.vmem [#allocation7], %s418_s22 }
  0x58   : > { %445 = vmatpush3.bf16.msra.mxu0 %v444_v5  ;;  %s331_s26 = sshll.u32 %s200_s25, 4  ;;  %s832_s9 = scalar_lea.hbm %s879_s3, %s424_s4  ;;  %s834_s26 = int_to_ptr.vmem [resolvable:$true] %s331_s26 }
  0x59   : > { %446 = vmatprep.subr.bf16.mxu0 %v649_v0  ;;  %s318_s10 = scalar_lea.sflag [#allocation4], %s809_s30  ;;  %s573_s11 = scalar_lea.vmem %s834_s26, 128 }
  0x5a   : > { %p574_p4 = scmp.ne.s32.totalorder %s834_s26, %s573_s11  ;;  %s652_s16 = smov [#allocation7]  }
  0x5b   : > { %s577_s27 = sshll.u32 %s652_s16, 4  ;;  %s578_s27 = int_to_ptr.vmem [resolvable:$false] %s577_s27 }
  0x5c   : > { %448 = vmatpush3.bf16.msra.mxu0 %v447_v7  ;;  %p575_p6 = pnand %p574_p4, %p764_p12  ;;  %s579_s28 = scalar_lea.vmem %s578_s27, 256 }
  0x5d   : > { %p580_p10 = scmp.lt.s32.totalorder %s834_s26, %s578_s27  ;;  %p581_p13 = scmp.lt.s32.totalorder %s579_s28, %s573_s11 }
  0x5e   : > { %p576_p8 = pneg %p575_p6 }
  0x5f   : > { %441 = vmatmul.mubr.msk.f32.vlgmr.msra.gmra.mrb[0].mxu0 %vm213_vm1, %v201_v8  ;;  %p582_p3 = por %p581_p13, %p580_p10 }
  0x61   : > { %p583_p7 = pnand %p582_p3, %p576_p8 }
 0x132   : > { %v283_v10 = vpop.f32.mrb[0].mxu0 }
 0x133   : > { %v284_v11 = vadd.f32 %v421_v9, %v283_v10  ;;  %v442_v12 = vpop.f32.mrb[1].mxu0 }
 0x135   : > { %v288_v13 = vmul.f32 0.70710677, %v284_v11  ;;  %v287_v38 = vmul.f32 0.5, %v284_v11 }
 0x137   : > { %v289_v14 = vand.u32 2147483647, %v288_v13  ;;  %vm311_vm2 = vcmp.ge.f32.partialorder %v288_v13, 0.0 }
 0x139   : > { %v290_v15 = vmul.f32 0.3275911, %v289_v14  ;;  %v305_v19 = vsub.f32 0.0, %v289_v14 }
 0x13b   : > { %v291_v16 = vadd.f32 1.0, %v290_v15  ;;  %v306_v22 = vmul.f32 %v305_v19, %v289_v14 }
 0x13d   : > { %511 = vrcp.f32 %v291_v16  ;;  %v307_v25 = vmul.f32 1.442695, %v306_v22 }
 0x13f   : > { %513 = vpow2.f32 %v307_v25 }
 0x147   : > { %v512_v17 = vpop.eup %511 }
 0x148   : > { %v293_v18 = vmul.f32 %v512_v17, %v291_v16 }
 0x149   : > { %v514_v33 = vpop.eup %513 }
 0x14a   : > { %v294_v20 = vsub.f32 2.0, %v293_v18 }
 0x14c   : > { %v295_v21 = vmul.f32 %v512_v17, %v294_v20 }
 0x14e   : > { %v296_v23 = vmul.f32 1.0614054, %v295_v21 }
 0x150   : > { %v297_v24 = vadd.f32 -1.4531521, %v296_v23 }
 0x152   : > { %v298_v26 = vmul.f32 %v297_v24, %v295_v21 }
 0x154   : > { %v299_v27 = vadd.f32 1.4214138, %v298_v26 }
 0x156   : > { %v300_v28 = vmul.f32 %v299_v27, %v295_v21 }
 0x158   : > { %v301_v29 = vadd.f32 -0.28449672, %v300_v28 }
 0x15a   : > { %v302_v30 = vmul.f32 %v301_v29, %v295_v21 }
 0x15c   : > { %v303_v31 = vadd.f32 0.2548296, %v302_v30 }
 0x15e   : > { %v304_v32 = vmul.f32 %v303_v31, %v295_v21 }
 0x160   : > { %v309_v34 = vmul.f32 %v514_v33, %v304_v32 }
 0x162   : > { %v310_v35 = vsub.f32 1.0, %v309_v34 }
 0x164   : > { %v312_v36 = vsub.f32 0.0, %v310_v35 }
 0x166   : > { %v313_v37 = vsel %vm311_vm2, %v310_v35, %v312_v36 }
 0x167   : > { %v314_v39 = vadd.f32 1.0, %v313_v37 }
 0x169   : > { %v315_v40 = vmul.f32 %v314_v39, %v287_v38 }
 0x16b   : > { %316 = vst [vmem:[%s200_s25] sm:$0xff] %v315_v40 }
 0x16c   : > { %586 = shalt.err (!%p583_p7)
}
 0x16d   : > { %s587_s29 = scalar_lea.hbm %s832_s9, 128  ;;  %s591_s22 = scalar_lea.hbm %s879_s3, 256 }
 0x16e   : > { %p588_p9 = scmp.ne.s32.totalorder %s832_s9, %s587_s29  ;;  %p592_p0 = scmp.lt.u32.totalorder %s832_s9, %s879_s3 }
 0x16f   : > { %p593_p11 = scmp.lt.u32.totalorder %s591_s22, %s587_s29  ;;  %p595_p4 = scmp.lt.u32.totalorder %s587_s29, %s832_s9 }
 0x170   : > { %p589_p2 = pnand %p588_p9, %p764_p12 }
 0x171   : > { %p594_p1 = por %p593_p11, %p592_p0 }
 0x172   : > { %p590_p5 = pneg %p589_p2 }
 0x173   : > { %p596_p6 = por %p595_p4, %p594_p1 }
 0x175   : > { %p597_p8 = pnand %p596_p6, %p590_p5 }
 0x177   : > { %600 = shalt.err (!%p597_p8)
}
 0x178   : > { %455 = dma.vmem_to_hbm [thread:$0]  (%p764_p12), %s834_s26, 128, %s832_s9, %s318_s10  }
 0x179 PF: > { %s343_s18 = sand.u32 1, %s631_s12   ;;  %p894_p10 = scmp.ne.s32.totalorder %s884_s19, 0 }
 0x17a   : > { %p895_p13 = scmp.ge.s32.totalorder %s643_s15, 2  ;;  %s344_s20 = scalar_lea.sflag [#allocation4], %s343_s18 }
 0x17c   : > { %p466_p3 = pnand %p895_p13, %p894_p10 }
 0x17e   : > { %626 = dma.done.wait (!%p466_p3), %s344_s20, 128  }
 0x17f   : > { %628 = vsyncadd (!%p466_p3), %s344_s20, 4294967168  ;;  %p17_p7 = scmp.ge.s32.totalorder %s729_s24, 4   ;;  %s896_s12 = smov %s635_s13 }
 0x180   : > { %s897_s13 = smov %s639_s14  ;;  %s898_s14 = smov %s760_s17 }
 0x181   : > { %s899_s15 = smov %s729_s24  ;;  %19 = sbr.rel (!%p17_p7) target bundleno = 6 (0x6), region = 81 }
 0x188   :  { %349 = vsyncpa [#allocation3], 1 }
 0x189   :  { %351 = vsyncpa [#allocation3 + $0x1], 1 }
 0x18a   :  { %352 = vsyncpa [#allocation6], 1 }
 0x18b   :  { %353 = vsyncpa [#allocation4], 1 }
 0x18c   :  { %355 = vsyncpa [#allocation4 + $0x1], 1 }

</bundles_post_ra>
